<compile_context>
chip_gen: v6e
topology: v6e:2x2x1
jax: 0.10.0
libtpu: 0.0.40
codegen_flags: <defaults>
</compile_context>

<pallas_src>
import math

import jax
import jax.numpy as jnp
from jax.experimental import pallas as pl
from jax.experimental.pallas import tpu as pltpu


def _realnvp_kernel(x_ref, w1_ref, b1_ref, w2s_ref, b2s_ref, w2m_ref, b2m_ref,
                    p_ref, zhat_ref, stats_ref):
    x = x_ref[...]                                     # (TB, D) f32, original column order
    TB, D = x.shape

    # Fused first layer for both nets (bf16 MXU, f32 accumulate).
    # Columns [0:H] = sig hidden, [H:2H] = mu hidden.
    xb = x.astype(jnp.bfloat16)
    h = jnp.dot(xb, w1_ref[...], preferred_element_type=jnp.float32) + b1_ref[...]
    h = jnp.maximum(h, 0.0).astype(jnp.bfloat16)       # (TB, 2H) bf16

    # Second layer, split into two dots (no (TB, 2D) intermediate / slices).
    # Results are already scattered to the ORIGINAL column order; exactly 0 on
    # the x1 columns (zeros are exact in bf16), so the affine step is the
    # identity there.
    sig = jnp.dot(h, w2s_ref[...], preferred_element_type=jnp.float32) + b2s_ref[...]
    mu = jnp.dot(h, w2m_ref[...], preferred_element_type=jnp.float32) + b2m_ref[...]

    # Affine coupling in original column order (identity on x1 columns).
    y = x * jnp.exp(sig) + mu                          # (TB, D) f32

    # z_hat = y[:, permutation] as an exact one-hot matmul (kept in f32 so the
    # x1 pass-through columns are bit-exact). Single dense full-width store.
    zhat_ref[...] = jnp.dot(y, p_ref[...], preferred_element_type=jnp.float32)

    # base_dist = iid standard Normal; sums are permutation invariant.
    log_2pi = math.log(2.0 * math.pi)
    logpz = jnp.sum(-0.5 * y * y, axis=-1, keepdims=True) - 0.5 * D * log_2pi
    logjac = jnp.sum(sig, axis=-1, keepdims=True)
    # Single full-block store of the (TB, 2) stats (col 0 = log_pz, 1 = log_jacob).
    col = jax.lax.broadcasted_iota(jnp.int32, (TB, 2), 1)
    stats_ref[...] = jnp.where(col == 0, logpz, logjac)


def _fold_params(params, permutation, D):
    """Fuse mu/sig nets and fold the feature permutation into the weights."""
    (w1s, b1s, w2s, b2s, w1m, b1m, w2m, b2m) = params
    split = D // 2
    H = w1s.shape[1]
    p1 = permutation[:split]
    p2 = permutation[split:]

    # First layer: (D, 2H);  x @ W1 == x1 @ [w1s | w1m].  Stored in bf16.
    # TODO(synk): the zero-padded W1 doubles the layer-1 contraction dim
    # (K = D instead of D/2); for D >> H prefer a scalar-prefetch/DMA gather of
    # the x1 columns with the unpadded (D/2, 2H) weights.
    w1f = jnp.concatenate([w1s, w1m], axis=1)                       # (split, 2H)
    W1 = jnp.zeros((D, 2 * H), jnp.float32).at[p1, :].set(w1f).astype(jnp.bfloat16)
    b1 = jnp.concatenate([b1s, b1m], axis=1)                        # (1, 2H) f32

    # Second layer split: sig and mu each (2H, D), scattered to original cols.
    W2_sig = jnp.zeros((2 * H, D), jnp.float32).at[:H, p2].set(w2s).astype(jnp.bfloat16)
    W2_mu = jnp.zeros((2 * H, D), jnp.float32).at[H:, p2].set(w2m).astype(jnp.bfloat16)
    b2_sig = jnp.zeros((1, D), jnp.float32).at[:, p2].set(b2s)
    b2_mu = jnp.zeros((1, D), jnp.float32).at[:, p2].set(b2m)

    # One-hot permutation matrix: (y @ P)[:, k] == y[:, permutation[k]].
    # TODO(synk): for wide-D / shallow-H (D > 4H) drop this dense matmul and
    # fold the output permutation into W2/b2 plus a one-off x gather instead.
    P = jnp.zeros((D, D), jnp.float32).at[permutation, jnp.arange(D)].set(1.0)
    return W1, b1, W2_sig, b2_sig, W2_mu, b2_mu, P


def _choose_tile(B, D, H, block_rows):
    """Batch-tile size under a cross-generation (v5e/v6e/v7x) VMEM budget."""
    # Resident weights (bf16 W1/W2_sig/W2_mu, f32 P + biases); assume worst
    # case (double-buffered) for the budget / limit estimate.
    weight_bytes = 2 * ((D * 2 * H) * 2 + 2 * (2 * H * D) * 2
                        + D * D * 4 + (2 * H + 2 * D + 2) * 4)
    # Per-row tile traffic: double-buffered x + z_hat (+ stats) in f32.
    row_bytes = 2 * 2 * (D * 4) + 2 * (2 * 4)
    budget = 40 << 20                         # fits v7x's 64 MiB physical VMEM
    avail = max(budget - weight_bytes, 1 << 20)
    tb = int(min(block_rows, B, max(8, avail // row_bytes)))
    if B >= 512:                              # >=2 grid steps so v7x's 2 TCs both work
        tb = min(tb, -(-B // 2))
    if tb < B:
        tb = max(256, (tb // 256) * 256)      # lane/sublane-friendly multi-step tile
        bp = -(-B // tb) * tb
    else:
        bp = -(-B // 8) * 8                   # single step: whole padded batch
        tb = bp
    vmem_est = weight_bytes + tb * row_bytes + (2 << 20)
    return tb, bp, vmem_est


def realnvp_forward(x, params, permutation, *, block_rows=4096):
    """RealNVP forward. Returns (z_hat, log_pz, log_jacob)."""
    B, D = x.shape
    H = params[0].shape[1]
    W1, b1, W2s, b2s, W2m, b2m, P = _fold_params(params, permutation, D)

    TB, Bp, vmem_est = _choose_tile(B, D, H, block_rows)
    x_in = jnp.pad(x, ((0, Bp - B), (0, 0))) if Bp != B else x
    grid = (Bp // TB,)
    const = lambda i: (0, 0)   # weights stay VMEM-resident across batch tiles
    vmem_limit = int(min(max(vmem_est, 32 << 20), 64 << 20))

    def run(single_buffer_consts):
        def cspec(shape):
            if single_buffer_consts:
                # Constant index_map -> never re-fetched; single-buffer to halve VMEM.
                return pl.BlockSpec(shape, const, pipeline_mode=pl.Buffered(1))
            return pl.BlockSpec(shape, const)

        z_hat, stats = pl.pallas_call(
            _realnvp_kernel,
            out_shape=(
                jax.ShapeDtypeStruct((Bp, D), jnp.float32),   # z_hat
                jax.ShapeDtypeStruct((Bp, 2), jnp.float32),   # [log_pz, log_jacob]
            ),
            grid=grid,
            in_specs=[
                pl.BlockSpec((TB, D), lambda i: (i, 0)),      # x
                cspec((D, 2 * H)),                            # W1   (bf16)
                cspec((1, 2 * H)),                            # b1
                cspec((2 * H, D)),                            # W2_sig (bf16)
                cspec((1, D)),                                # b2_sig
                cspec((2 * H, D)),                            # W2_mu (bf16)
                cspec((1, D)),                                # b2_mu
                cspec((D, D)),                                # P (f32, exact one-hot)
            ],
            out_specs=(
                pl.BlockSpec((TB, D), lambda i: (i, 0)),
                pl.BlockSpec((TB, 2), lambda i: (i, 0)),
            ),
            compiler_params=pltpu.CompilerParams(
                dimension_semantics=("parallel",),
                vmem_limit_bytes=vmem_limit),
        )(x_in, W1, b1, W2s, b2s, W2m, b2m, P)
        return jax.block_until_ready((z_hat, stats))

    try:
        z_hat, stats = run(True)
    except Exception:
        # Fallback: default double-buffered pipelining if pl.Buffered(1) is
        # rejected by the installed Pallas version.
        z_hat, stats = run(False)

    return z_hat[:B], stats[:B, 0], stats[:B, 1]


def _make_params(key, split, hidden):
    """Deterministic 2-layer MLP params for sig_net and mu_net."""
    ks = jax.random.split(key, 8)

    def lin(k, fan_in, fan_out):
        scale = 1.0 / math.sqrt(fan_in)
        return jax.random.uniform(k, (fan_in, fan_out), jnp.float32, -scale, scale)

    w1s = lin(ks[0], split, hidden)
    b1s = jax.random.uniform(ks[1], (1, hidden), jnp.float32, -0.05, 0.05)
    w2s = lin(ks[2], hidden, split)
    b2s = jax.random.uniform(ks[3], (1, split), jnp.float32, -0.05, 0.05)
    w1m = lin(ks[4], split, hidden)
    b1m = jax.random.uniform(ks[5], (1, hidden), jnp.float32, -0.05, 0.05)
    w2m = lin(ks[6], hidden, split)
    b2m = jax.random.uniform(ks[7], (1, split), jnp.float32, -0.05, 0.05)
    return (w1s, b1s, w2s, b2s, w1m, b1m, w2m, b2m)


def _reference(x, params, permutation):
    """Pure-JAX reference with the ORIGINAL (unfused, unpermuted, f32) weights."""
    (w1s, b1s, w2s, b2s, w1m, b1m, w2m, b2m) = params
    split = x.shape[1] // 2
    xp = x[:, permutation]
    x1, x2 = xp[:, :split], xp[:, split:]
    sig = jnp.maximum(x1 @ w1s + b1s, 0.0) @ w2s + b2s
    mu = jnp.maximum(x1 @ w1m + b1m, 0.0) @ w2m + b2m
    z2 = x2 * jnp.exp(sig) + mu
    z = jnp.concatenate([x1, z2], axis=-1)
    log_pz = jnp.sum(-0.5 * z * z - 0.5 * math.log(2 * math.pi), axis=-1)
    log_jac = jnp.sum(sig, axis=-1)
    return z, log_pz, log_jac


if __name__ == "__main__":
    # TODO(synk): class_condition=True path (base_dist.log_probs_classwise) and
    # inverse() are not part of the default forward and are not implemented.
    key = jax.random.PRNGKey(0)
    k_x, k_p, k_w = jax.random.split(key, 3)

    B, D, H = 8, 16, 32           # batch, dims, hidden width of mu/sig nets
    split = D // 2

    x = jax.random.normal(k_x, (B, D), jnp.float32)
    permutation = jax.random.permutation(k_p, D)          # torch.randperm(dims)
    params = _make_params(k_w, split, H)

    z_hat, log_pz, log_jacob = realnvp_forward(x, params, permutation)
    jax.block_until_ready((z_hat, log_pz, log_jacob))

    # Correctness check vs. pure-JAX f32 reference.  Tolerances account for the
    # bf16-weight MXU matmuls (the x1 pass-through columns remain exact).
    z_ref, pz_ref, lj_ref = _reference(x, params, permutation)
    assert jnp.allclose(z_hat, z_ref, atol=5e-2, rtol=5e-2)
    assert jnp.allclose(log_pz, pz_ref, atol=5e-1, rtol=5e-2)
    assert jnp.allclose(log_jacob, lj_ref, atol=2e-1, rtol=5e-2)

    print("KERNEL_OK")
</pallas_src>

<mosaic_0001>
module attributes {stable_mosaic.version = 11 : i64} {
  func.func @_realnvp_kernel(%arg0: i32, %arg1: memref<8x16xf32, #tpu.memory_space<vmem>>, %arg2: memref<16x64xbf16, #tpu.memory_space<vmem>>, %arg3: memref<1x64xf32, #tpu.memory_space<vmem>>, %arg4: memref<64x16xbf16, #tpu.memory_space<vmem>>, %arg5: memref<1x16xf32, #tpu.memory_space<vmem>>, %arg6: memref<64x16xbf16, #tpu.memory_space<vmem>>, %arg7: memref<1x16xf32, #tpu.memory_space<vmem>>, %arg8: memref<16x16xf32, #tpu.memory_space<vmem>>, %arg9: memref<8x16xf32, #tpu.memory_space<vmem>>, %arg10: memref<8x2xf32, #tpu.memory_space<vmem>>) attributes {dimension_semantics = [#tpu.dimension_semantics<parallel>], iteration_bounds = array<i64: 1>, scalar_prefetch = 0 : i64, scratch_operands = 0 : i64, tpu.core_type = #tpu.core_type<tc>, window_params = [{transform_indices = @transform_0, window_bounds = array<i64: 8, 16>}, {pipeline_mode = #tpu.pipeline_mode<synchronous>, transform_indices = @transform_1, window_bounds = array<i64: 16, 64>}, {pipeline_mode = #tpu.pipeline_mode<synchronous>, transform_indices = @transform_2, window_bounds = array<i64: 1, 64>}, {pipeline_mode = #tpu.pipeline_mode<synchronous>, transform_indices = @transform_3, window_bounds = array<i64: 64, 16>}, {pipeline_mode = #tpu.pipeline_mode<synchronous>, transform_indices = @transform_4, window_bounds = array<i64: 1, 16>}, {pipeline_mode = #tpu.pipeline_mode<synchronous>, transform_indices = @transform_5, window_bounds = array<i64: 64, 16>}, {pipeline_mode = #tpu.pipeline_mode<synchronous>, transform_indices = @transform_6, window_bounds = array<i64: 1, 16>}, {pipeline_mode = #tpu.pipeline_mode<synchronous>, transform_indices = @transform_7, window_bounds = array<i64: 16, 16>}, {transform_indices = @transform_8, window_bounds = array<i64: 8, 16>}, {transform_indices = @transform_9, window_bounds = array<i64: 8, 2>}]} {
    %c0 = arith.constant 0 : index
    %c0_0 = arith.constant 0 : index
    %0 = vector.load %arg1[%c0, %c0_0] : memref<8x16xf32, #tpu.memory_space<vmem>>, vector<8x16xf32>
    %1 = arith.truncf %0 : vector<8x16xf32> to vector<8x16xbf16>
    %c0_1 = arith.constant 0 : index
    %c0_2 = arith.constant 0 : index
    %2 = vector.load %arg2[%c0_1, %c0_2] : memref<16x64xbf16, #tpu.memory_space<vmem>>, vector<16x64xbf16>
    %cst = arith.constant dense<0.000000e+00> : vector<8x64xf32>
    %3 = tpu.matmul %1, %2, %cst {dimension_numbers = #tpu.dot_dimension_numbers<[1], [0], [0], [1], [0, 0, 1, 1], [], []>} : vector<8x16xbf16>, vector<16x64xbf16>, vector<8x64xf32> -> vector<8x64xf32>
    %c0_3 = arith.constant 0 : index
    %c0_4 = arith.constant 0 : index
    %4 = vector.load %arg3[%c0_3, %c0_4] : memref<1x64xf32, #tpu.memory_space<vmem>>, vector<1x64xf32>
    %5 = vector.broadcast %4 : vector<1x64xf32> to vector<8x64xf32>
    %6 = arith.addf %3, %5 : vector<8x64xf32>
    %cst_5 = arith.constant 0.000000e+00 : f32
    %7 = vector.broadcast %cst_5 : f32 to vector<8x64xf32>
    %8 = arith.maximumf %6, %7 : vector<8x64xf32>
    %9 = arith.truncf %8 : vector<8x64xf32> to vector<8x64xbf16>
    %c0_6 = arith.constant 0 : index
    %c0_7 = arith.constant 0 : index
    %10 = vector.load %arg4[%c0_6, %c0_7] : memref<64x16xbf16, #tpu.memory_space<vmem>>, vector<64x16xbf16>
    %cst_8 = arith.constant dense<0.000000e+00> : vector<8x16xf32>
    %11 = tpu.matmul %9, %10, %cst_8 {dimension_numbers = #tpu.dot_dimension_numbers<[1], [0], [0], [1], [0, 0, 1, 1], [], []>} : vector<8x64xbf16>, vector<64x16xbf16>, vector<8x16xf32> -> vector<8x16xf32>
    %c0_9 = arith.constant 0 : index
    %c0_10 = arith.constant 0 : index
    %12 = vector.load %arg5[%c0_9, %c0_10] : memref<1x16xf32, #tpu.memory_space<vmem>>, vector<1x16xf32>
    %13 = vector.broadcast %12 : vector<1x16xf32> to vector<8x16xf32>
    %14 = arith.addf %11, %13 : vector<8x16xf32>
    %c0_11 = arith.constant 0 : index
    %c0_12 = arith.constant 0 : index
    %15 = vector.load %arg6[%c0_11, %c0_12] : memref<64x16xbf16, #tpu.memory_space<vmem>>, vector<64x16xbf16>
    %cst_13 = arith.constant dense<0.000000e+00> : vector<8x16xf32>
    %16 = tpu.matmul %9, %15, %cst_13 {dimension_numbers = #tpu.dot_dimension_numbers<[1], [0], [0], [1], [0, 0, 1, 1], [], []>} : vector<8x64xbf16>, vector<64x16xbf16>, vector<8x16xf32> -> vector<8x16xf32>
    %c0_14 = arith.constant 0 : index
    %c0_15 = arith.constant 0 : index
    %17 = vector.load %arg7[%c0_14, %c0_15] : memref<1x16xf32, #tpu.memory_space<vmem>>, vector<1x16xf32>
    %18 = vector.broadcast %17 : vector<1x16xf32> to vector<8x16xf32>
    %19 = arith.addf %16, %18 : vector<8x16xf32>
    %20 = math.exp %14 : vector<8x16xf32>
    %21 = arith.mulf %0, %20 : vector<8x16xf32>
    %22 = arith.addf %21, %19 : vector<8x16xf32>
    %c0_16 = arith.constant 0 : index
    %c0_17 = arith.constant 0 : index
    %23 = vector.load %arg8[%c0_16, %c0_17] : memref<16x16xf32, #tpu.memory_space<vmem>>, vector<16x16xf32>
    %cst_18 = arith.constant dense<0.000000e+00> : vector<8x16xf32>
    %24 = tpu.matmul %22, %23, %cst_18 {dimension_numbers = #tpu.dot_dimension_numbers<[1], [0], [0], [1], [0, 0, 1, 1], [], []>} : vector<8x16xf32>, vector<16x16xf32>, vector<8x16xf32> -> vector<8x16xf32>
    %c0_19 = arith.constant 0 : index
    %c0_20 = arith.constant 0 : index
    %25 = vector.load %arg9[%c0_19, %c0_20] : memref<8x16xf32, #tpu.memory_space<vmem>>, vector<8x16xf32>
    tpu.vector_store %arg9[%c0_19, %c0_20], %24 {strides = array<i32>} : memref<8x16xf32, #tpu.memory_space<vmem>>, vector<8x16xf32>,
    %cst_21 = arith.constant -5.000000e-01 : f32
    %26 = vector.broadcast %cst_21 : f32 to vector<8x16xf32>
    %27 = arith.mulf %26, %22 : vector<8x16xf32>
    %28 = arith.mulf %27, %22 : vector<8x16xf32>
    %cst_22 = arith.constant dense<0.000000e+00> : vector<8xf32>
    %29 = vector.multi_reduction <add>, %28, %cst_22 [1] : vector<8x16xf32> to vector<8xf32>
    %30 = vector.shape_cast %29 : vector<8xf32> to vector<8x1xf32>
    %cst_23 = arith.constant 14.7030163 : f32
    %31 = vector.broadcast %cst_23 : f32 to vector<8x1xf32>
    %32 = arith.subf %30, %31 : vector<8x1xf32>
    %cst_24 = arith.constant dense<0.000000e+00> : vector<8xf32>
    %33 = vector.multi_reduction <add>, %14, %cst_24 [1] : vector<8x16xf32> to vector<8xf32>
    %34 = vector.shape_cast %33 : vector<8xf32> to vector<8x1xf32>
    %35 = tpu.iota {dimensions = array<i32: 1>} : vector<8x2xi32>
    %c0_i32 = arith.constant 0 : i32
    %36 = vector.broadcast %c0_i32 : i32 to vector<8x2xi32>
    %37 = arith.cmpi eq, %35, %36 : vector<8x2xi32>
    %38 = vector.shape_cast %32 : vector<8x1xf32> to vector<8x1xf32>
    %39 = vector.broadcast %38 : vector<8x1xf32> to vector<8x2xf32>
    %40 = vector.shape_cast %34 : vector<8x1xf32> to vector<8x1xf32>
    %41 = vector.broadcast %40 : vector<8x1xf32> to vector<8x2xf32>
    %42 = arith.select %37, %39, %41 : vector<8x2xi1>, vector<8x2xf32>
    %c0_25 = arith.constant 0 : index
    %c0_26 = arith.constant 0 : index
    %43 = vector.load %arg10[%c0_25, %c0_26] : memref<8x2xf32, #tpu.memory_space<vmem>>, vector<8x2xf32>
    tpu.vector_store %arg10[%c0_25, %c0_26], %42 {strides = array<i32>} : memref<8x2xf32, #tpu.memory_space<vmem>>, vector<8x2xf32>,
    return
  }
  func.func @transform_0(%arg0: i32) -> (i32, i32) {
    %c0_i32 = arith.constant 0 : i32
    %c0_i32_0 = arith.constant 0 : i32
    return %arg0, %c0_i32 : i32, i32
  }
  func.func @transform_1(%arg0: i32) -> (i32, i32) {
    %c0_i32 = arith.constant 0 : i32
    %c0_i32_0 = arith.constant 0 : i32
    %c0_i32_1 = arith.constant 0 : i32
    return %c0_i32, %c0_i32_0 : i32, i32
  }
  func.func @transform_2(%arg0: i32) -> (i32, i32) {
    %c0_i32 = arith.constant 0 : i32
    %c0_i32_0 = arith.constant 0 : i32
    %c0_i32_1 = arith.constant 0 : i32
    return %c0_i32, %c0_i32_0 : i32, i32
  }
  func.func @transform_3(%arg0: i32) -> (i32, i32) {
    %c0_i32 = arith.constant 0 : i32
    %c0_i32_0 = arith.constant 0 : i32
    %c0_i32_1 = arith.constant 0 : i32
    return %c0_i32, %c0_i32_0 : i32, i32
  }
  func.func @transform_4(%arg0: i32) -> (i32, i32) {
    %c0_i32 = arith.constant 0 : i32
    %c0_i32_0 = arith.constant 0 : i32
    %c0_i32_1 = arith.constant 0 : i32
    return %c0_i32, %c0_i32_0 : i32, i32
  }
  func.func @transform_5(%arg0: i32) -> (i32, i32) {
    %c0_i32 = arith.constant 0 : i32
    %c0_i32_0 = arith.constant 0 : i32
    %c0_i32_1 = arith.constant 0 : i32
    return %c0_i32, %c0_i32_0 : i32, i32
  }
  func.func @transform_6(%arg0: i32) -> (i32, i32) {
    %c0_i32 = arith.constant 0 : i32
    %c0_i32_0 = arith.constant 0 : i32
    %c0_i32_1 = arith.constant 0 : i32
    return %c0_i32, %c0_i32_0 : i32, i32
  }
  func.func @transform_7(%arg0: i32) -> (i32, i32) {
    %c0_i32 = arith.constant 0 : i32
    %c0_i32_0 = arith.constant 0 : i32
    %c0_i32_1 = arith.constant 0 : i32
    return %c0_i32, %c0_i32_0 : i32, i32
  }
  func.func @transform_8(%arg0: i32) -> (i32, i32) {
    %c0_i32 = arith.constant 0 : i32
    %c0_i32_0 = arith.constant 0 : i32
    return %arg0, %c0_i32 : i32, i32
  }
  func.func @transform_9(%arg0: i32) -> (i32, i32) {
    %c0_i32 = arith.constant 0 : i32
    %c0_i32_0 = arith.constant 0 : i32
    return %arg0, %c0_i32 : i32, i32
  }
}

module attributes {stable_mosaic.version = 11 : i64} {
  func.func @_realnvp_kernel(%arg0: i32, %arg1: memref<8x16xf32, #tpu.memory_space<vmem>>, %arg2: memref<16x64xbf16, #tpu.memory_space<vmem>>, %arg3: memref<1x64xf32, #tpu.memory_space<vmem>>, %arg4: memref<64x16xbf16, #tpu.memory_space<vmem>>, %arg5: memref<1x16xf32, #tpu.memory_space<vmem>>, %arg6: memref<64x16xbf16, #tpu.memory_space<vmem>>, %arg7: memref<1x16xf32, #tpu.memory_space<vmem>>, %arg8: memref<16x16xf32, #tpu.memory_space<vmem>>, %arg9: memref<8x16xf32, #tpu.memory_space<vmem>>, %arg10: memref<8x2xf32, #tpu.memory_space<vmem>>) attributes {dimension_semantics = [#tpu.dimension_semantics<parallel>], iteration_bounds = array<i64: 1>, scalar_prefetch = 0 : i64, scratch_operands = 0 : i64, tpu.core_type = #tpu.core_type<tc>, window_params = [{transform_indices = @transform_0, window_bounds = array<i64: 8, 16>}, {pipeline_mode = #tpu.pipeline_mode<synchronous>, transform_indices = @transform_1, window_bounds = array<i64: 16, 64>}, {pipeline_mode = #tpu.pipeline_mode<synchronous>, transform_indices = @transform_2, window_bounds = array<i64: 1, 64>}, {pipeline_mode = #tpu.pipeline_mode<synchronous>, transform_indices = @transform_3, window_bounds = array<i64: 64, 16>}, {pipeline_mode = #tpu.pipeline_mode<synchronous>, transform_indices = @transform_4, window_bounds = array<i64: 1, 16>}, {pipeline_mode = #tpu.pipeline_mode<synchronous>, transform_indices = @transform_5, window_bounds = array<i64: 64, 16>}, {pipeline_mode = #tpu.pipeline_mode<synchronous>, transform_indices = @transform_6, window_bounds = array<i64: 1, 16>}, {pipeline_mode = #tpu.pipeline_mode<synchronous>, transform_indices = @transform_7, window_bounds = array<i64: 16, 16>}, {transform_indices = @transform_8, window_bounds = array<i64: 8, 16>}, {transform_indices = @transform_9, window_bounds = array<i64: 8, 2>}]} {
    %c0 = arith.constant 0 : index
    %c0_0 = arith.constant 0 : index
    %0 = vector.load %arg1[%c0, %c0_0] : memref<8x16xf32, #tpu.memory_space<vmem>>, vector<8x16xf32>
    %1 = arith.truncf %0 : vector<8x16xf32> to vector<8x16xbf16>
    %c0_1 = arith.constant 0 : index
    %c0_2 = arith.constant 0 : index
    %2 = vector.load %arg2[%c0_1, %c0_2] : memref<16x64xbf16, #tpu.memory_space<vmem>>, vector<16x64xbf16>
    %cst = arith.constant dense<0.000000e+00> : vector<8x64xf32>
    %3 = tpu.matmul %1, %2, %cst {dimension_numbers = #tpu.dot_dimension_numbers<[1], [0], [0], [1], [0, 0, 1, 1], [], []>} : vector<8x16xbf16>, vector<16x64xbf16>, vector<8x64xf32> -> vector<8x64xf32>
    %c0_3 = arith.constant 0 : index
    %c0_4 = arith.constant 0 : index
    %4 = vector.load %arg3[%c0_3, %c0_4] : memref<1x64xf32, #tpu.memory_space<vmem>>, vector<1x64xf32>
    %5 = vector.broadcast %4 : vector<1x64xf32> to vector<8x64xf32>
    %6 = arith.addf %3, %5 : vector<8x64xf32>
    %cst_5 = arith.constant 0.000000e+00 : f32
    %7 = vector.broadcast %cst_5 : f32 to vector<8x64xf32>
    %8 = arith.maximumf %6, %7 : vector<8x64xf32>
    %9 = arith.truncf %8 : vector<8x64xf32> to vector<8x64xbf16>
    %c0_6 = arith.constant 0 : index
    %c0_7 = arith.constant 0 : index
    %10 = vector.load %arg4[%c0_6, %c0_7] : memref<64x16xbf16, #tpu.memory_space<vmem>>, vector<64x16xbf16>
    %cst_8 = arith.constant dense<0.000000e+00> : vector<8x16xf32>
    %11 = tpu.matmul %9, %10, %cst_8 {dimension_numbers = #tpu.dot_dimension_numbers<[1], [0], [0], [1], [0, 0, 1, 1], [], []>} : vector<8x64xbf16>, vector<64x16xbf16>, vector<8x16xf32> -> vector<8x16xf32>
    %c0_9 = arith.constant 0 : index
    %c0_10 = arith.constant 0 : index
    %12 = vector.load %arg5[%c0_9, %c0_10] : memref<1x16xf32, #tpu.memory_space<vmem>>, vector<1x16xf32>
    %13 = vector.broadcast %12 : vector<1x16xf32> to vector<8x16xf32>
    %14 = arith.addf %11, %13 : vector<8x16xf32>
    %c0_11 = arith.constant 0 : index
    %c0_12 = arith.constant 0 : index
    %15 = vector.load %arg6[%c0_11, %c0_12] : memref<64x16xbf16, #tpu.memory_space<vmem>>, vector<64x16xbf16>
    %cst_13 = arith.constant dense<0.000000e+00> : vector<8x16xf32>
    %16 = tpu.matmul %9, %15, %cst_13 {dimension_numbers = #tpu.dot_dimension_numbers<[1], [0], [0], [1], [0, 0, 1, 1], [], []>} : vector<8x64xbf16>, vector<64x16xbf16>, vector<8x16xf32> -> vector<8x16xf32>
    %c0_14 = arith.constant 0 : index
    %c0_15 = arith.constant 0 : index
    %17 = vector.load %arg7[%c0_14, %c0_15] : memref<1x16xf32, #tpu.memory_space<vmem>>, vector<1x16xf32>
    %18 = vector.broadcast %17 : vector<1x16xf32> to vector<8x16xf32>
    %19 = arith.addf %16, %18 : vector<8x16xf32>
    %20 = math.exp %14 : vector<8x16xf32>
    %21 = arith.mulf %0, %20 : vector<8x16xf32>
    %22 = arith.addf %21, %19 : vector<8x16xf32>
    %c0_16 = arith.constant 0 : index
    %c0_17 = arith.constant 0 : index
    %23 = vector.load %arg8[%c0_16, %c0_17] : memref<16x16xf32, #tpu.memory_space<vmem>>, vector<16x16xf32>
    %cst_18 = arith.constant dense<0.000000e+00> : vector<8x16xf32>
    %24 = tpu.matmul %22, %23, %cst_18 {dimension_numbers = #tpu.dot_dimension_numbers<[1], [0], [0], [1], [0, 0, 1, 1], [], []>} : vector<8x16xf32>, vector<16x16xf32>, vector<8x16xf32> -> vector<8x16xf32>
    %c0_19 = arith.constant 0 : index
    %c0_20 = arith.constant 0 : index
    %25 = vector.load %arg9[%c0_19, %c0_20] : memref<8x16xf32, #tpu.memory_space<vmem>>, vector<8x16xf32>
    tpu.vector_store %arg9[%c0_19, %c0_20], %24 {strides = array<i32>} : memref<8x16xf32, #tpu.memory_space<vmem>>, vector<8x16xf32>,
    %cst_21 = arith.constant -5.000000e-01 : f32
    %26 = vector.broadcast %cst_21 : f32 to vector<8x16xf32>
    %27 = arith.mulf %26, %22 : vector<8x16xf32>
    %28 = arith.mulf %27, %22 : vector<8x16xf32>
    %cst_22 = arith.constant dense<0.000000e+00> : vector<8xf32>
    %29 = vector.multi_reduction <add>, %28, %cst_22 [1] : vector<8x16xf32> to vector<8xf32>
    %30 = vector.shape_cast %29 : vector<8xf32> to vector<8x1xf32>
    %cst_23 = arith.constant 14.7030163 : f32
    %31 = vector.broadcast %cst_23 : f32 to vector<8x1xf32>
    %32 = arith.subf %30, %31 : vector<8x1xf32>
    %cst_24 = arith.constant dense<0.000000e+00> : vector<8xf32>
    %33 = vector.multi_reduction <add>, %14, %cst_24 [1] : vector<8x16xf32> to vector<8xf32>
    %34 = vector.shape_cast %33 : vector<8xf32> to vector<8x1xf32>
    %35 = tpu.iota {dimensions = array<i32: 1>} : vector<8x2xi32>
    %c0_i32 = arith.constant 0 : i32
    %36 = vector.broadcast %c0_i32 : i32 to vector<8x2xi32>
    %37 = arith.cmpi eq, %35, %36 : vector<8x2xi32>
    %38 = vector.shape_cast %32 : vector<8x1xf32> to vector<8x1xf32>
    %39 = vector.broadcast %38 : vector<8x1xf32> to vector<8x2xf32>
    %40 = vector.shape_cast %34 : vector<8x1xf32> to vector<8x1xf32>
    %41 = vector.broadcast %40 : vector<8x1xf32> to vector<8x2xf32>
    %42 = arith.select %37, %39, %41 : vector<8x2xi1>, vector<8x2xf32>
    %c0_25 = arith.constant 0 : index
    %c0_26 = arith.constant 0 : index
    %43 = vector.load %arg10[%c0_25, %c0_26] : memref<8x2xf32, #tpu.memory_space<vmem>>, vector<8x2xf32>
    tpu.vector_store %arg10[%c0_25, %c0_26], %42 {strides = array<i32>} : memref<8x2xf32, #tpu.memory_space<vmem>>, vector<8x2xf32>,
    return
  }
  func.func @transform_0(%arg0: i32) -> (i32, i32) {
    %c0_i32 = arith.constant 0 : i32
    %c0_i32_0 = arith.constant 0 : i32
    return %arg0, %c0_i32 : i32, i32
  }
  func.func @transform_1(%arg0: i32) -> (i32, i32) {
    %c0_i32 = arith.constant 0 : i32
    %c0_i32_0 = arith.constant 0 : i32
    %c0_i32_1 = arith.constant 0 : i32
    return %c0_i32, %c0_i32_0 : i32, i32
  }
  func.func @transform_2(%arg0: i32) -> (i32, i32) {
    %c0_i32 = arith.constant 0 : i32
    %c0_i32_0 = arith.constant 0 : i32
    %c0_i32_1 = arith.constant 0 : i32
    return %c0_i32, %c0_i32_0 : i32, i32
  }
  func.func @transform_3(%arg0: i32) -> (i32, i32) {
    %c0_i32 = arith.constant 0 : i32
    %c0_i32_0 = arith.constant 0 : i32
    %c0_i32_1 = arith.constant 0 : i32
    return %c0_i32, %c0_i32_0 : i32, i32
  }
  func.func @transform_4(%arg0: i32) -> (i32, i32) {
    %c0_i32 = arith.constant 0 : i32
    %c0_i32_0 = arith.constant 0 : i32
    %c0_i32_1 = arith.constant 0 : i32
    return %c0_i32, %c0_i32_0 : i32, i32
  }
  func.func @transform_5(%arg0: i32) -> (i32, i32) {
    %c0_i32 = arith.constant 0 : i32
    %c0_i32_0 = arith.constant 0 : i32
    %c0_i32_1 = arith.constant 0 : i32
    return %c0_i32, %c0_i32_0 : i32, i32
  }
  func.func @transform_6(%arg0: i32) -> (i32, i32) {
    %c0_i32 = arith.constant 0 : i32
    %c0_i32_0 = arith.constant 0 : i32
    %c0_i32_1 = arith.constant 0 : i32
    return %c0_i32, %c0_i32_0 : i32, i32
  }
  func.func @transform_7(%arg0: i32) -> (i32, i32) {
    %c0_i32 = arith.constant 0 : i32
    %c0_i32_0 = arith.constant 0 : i32
    %c0_i32_1 = arith.constant 0 : i32
    return %c0_i32, %c0_i32_0 : i32, i32
  }
  func.func @transform_8(%arg0: i32) -> (i32, i32) {
    %c0_i32 = arith.constant 0 : i32
    %c0_i32_0 = arith.constant 0 : i32
    return %arg0, %c0_i32 : i32, i32
  }
  func.func @transform_9(%arg0: i32) -> (i32, i32) {
    %c0_i32 = arith.constant 0 : i32
    %c0_i32_0 = arith.constant 0 : i32
    return %arg0, %c0_i32 : i32, i32
  }
}

</mosaic_0001>

<bundles_post_ra>
// kernel: tpu_custom_call.1
= control target key start
LH: loop header
LB: loop body
LE: loop exit
PB: predicated region body
PF: predicated region fallthrough
CT: control target
= control target key end

     0   :  { %v476_v1 = vmov 0.0   ;;  %vm50_vm0 = vcmask 130048   ;;  %vm477_vm1 = vmmov 0   ;;  %s594_s0 = inlined_call_operand.vmem [shape: f32[8,16], index: 0, kind: input, shape index: {}]   ;;  %s595_s1 = inlined_call_operand.vmem [shape: bf16[16,64], index: 1, kind: input, shape index: {}]   ;;  %s596_s2 = inlined_call_operand.vmem [shape: f32[1,64], index: 2, kind: input, shape index: {}]   ;;  %s597_s3 = inlined_call_operand.vmem [shape: bf16[64,16], index: 3, kind: input, shape index: {}]   ;;  %s598_s4 = inlined_call_operand.vmem [shape: f32[1,16], index: 4, kind: input, shape index: {}]   ;;  %s599_s5 = inlined_call_operand.vmem [shape: bf16[64,16], index: 5, kind: input, shape index: {}]   ;;  %s600_s6 = inlined_call_operand.vmem [shape: f32[1,16], index: 6, kind: input, shape index: {}]   ;;  %s601_s7 = inlined_call_operand.vmem [shape: f32[16,16], index: 7, kind: input, shape index: {}]   ;;  %s602_s8 = inlined_call_operand.hbm [shape: f32[8,16], index: 8, kind: output, shape index: {0}]   ;;  %s603_s9 = inlined_call_operand.vmem [shape: f32[8,2], index: 9, kind: output, shape index: {1}]  }
   0x1   :  { %v443_v0 = vld [vmem:[%s595_s1] sm:$0xff]   ;;  %403 = vmatprep.subr.bf16.mxu0 %v476_v1  ;;  %409 = vmatprep.subr.bf16.mxu1 %v476_v1  ;;  %v444_v3 = vld [vmem:[%s597_s3 + $0x18] sm:$0xff]   ;;  %v446_v6 = vld [vmem:[%s597_s3 + $0x10] sm:$0xff]  }
   0x2   :  { %v535_v2 = vld [vmem:[%s594_s0] sm:$0xff]  ;;  %404 = vmatpush3.bf16.msra.mxu0 %v443_v0  ;;  %405 = vmatprep.mubr.msk.bf16.mxu0 %vm477_vm1, %v476_v1  ;;  %v445_v5 = vld [vmem:[%s599_s5 + $0x18] sm:$0xff]   ;;  %v447_v7 = vld [vmem:[%s599_s5 + $0x10] sm:$0xff]  }
   0x3   :  { %v34_v4 = vpack.c.bf16 %v535_v2, %v535_v2  ;;  %421 = vmatprep.subr.bf16.mxu0 %v476_v1  ;;  %410 = vmatpush3.bf16.msra.mxu1 %v444_v3 }
   0x4   :  { %411 = vmatprep.subr.bf16.mxu1 %v476_v1  ;;  %417 = vmatprep.mubr.msk.bf16.mxu1 %vm477_vm1, %v476_v1 }
   0x5   :  { %406 = vmatmul.mubr.msk.bf16.vlgmr.msra.gmra.mxu0 %vm50_vm0, %v34_v4 }
   0x6   :  { %422 = vmatpush3.bf16.msra.mxu0 %v445_v5  ;;  %429 = vmatprep.mubr.msk.bf16.mxu0 %vm477_vm1, %v476_v1 }
   0x7   :  { %423 = vmatprep.subr.bf16.mxu0 %v476_v1  ;;  %412 = vmatpush3.bf16.msra.mxu1 %v446_v6 }
   0x8   :  { %413 = vmatprep.subr.bf16.mxu1 %v476_v1 }
   0x9   :  { %15 = vsyncpa [#allocation3], 0  ;;  %v448_v8 = vld [vmem:[%s597_s3 + $0x8] sm:$0xff]   ;;  %v450_v10 = vld [vmem:[%s597_s3] sm:$0xff]   ;;  %vm135_vm2 = vcmask 523264   ;;  %v347_v42 = vlaneseq  ;;  %vm351_vm4 = vcmask 15360  }
   0xa   :  { %424 = vmatpush3.bf16.msra.mxu0 %v447_v7  ;;  %v449_v9 = vld [vmem:[%s599_s5 + $0x8] sm:$0xff]   ;;  %v451_v11 = vld [vmem:[%s599_s5] sm:$0xff]  }
   0xb   :  { %425 = vmatprep.subr.bf16.mxu0 %v476_v1  ;;  %414 = vmatpush3.bf16.msra.mxu1 %v448_v8  ;;  %v371_v12 = vld [vmem:[%s596_s2] ss:$0 sm:$0xff]  ;;  %v263_v20 = vld [vmem:[%s601_s7 + $0x8] sm:$0xff]  ;;  %v348_v43 = vand.u32 127, %v347_v42 }
   0xc   :  { %415 = vmatprep.subr.bf16.mxu1 %v476_v1  ;;  %v262_v21 = vld [vmem:[%s601_s7] sm:$0xff]  ;;  %s478_s7 = smov [#allocation2]  }
   0xd   :  { %v374_v22 = vld [vmem:[%s598_s4] ss:$0 sm:$0xff]  ;;  %vm349_vm3 = vcmp.eq.s32.totalorder %v348_v43, 0  ;;  %s359_s13 = sshll.u32 %s478_s7, 4  ;;  %s360_s13 = int_to_ptr.vmem [resolvable:$true] %s359_s13 }
   0xe   :  { %426 = vmatpush3.bf16.msra.mxu0 %v449_v9  ;;  %v380_v33 = vld [vmem:[%s600_s6] ss:$0 sm:$0xff]  ;;  %s454_s14 = scalar_lea.vmem %s360_s13, 128  ;;  %p459_p1 = scmp.lt.s32.totalorder %s360_s13, %s360_s13 }
   0xf   :  { %427 = vmatprep.subr.bf16.mxu0 %v476_v1  ;;  %416 = vmatpush3.bf16.msra.mxu1 %v450_v10  ;;  %p455_p0 = scmp.ne.s32.totalorder %s360_s13, %s454_s14  ;;  %p460_p2 = scmp.lt.s32.totalorder %s454_s14, %s454_s14 }
  0x10   :  { %433 = vmatprep.subr.mxu1 %v476_v1 }
  0x11   :  { %p461_p3 = por %p460_p2, %p459_p1 }
  0x12   :  { %428 = vmatpush3.bf16.msra.mxu0 %v451_v11 }
  0x13   :  { %p462_p4 = pnand %p461_p3, %p455_p0 }
  0xc5   :  { %v88_v13 = vpop.f32.mrf.mxu0 }
  0xc6   :  { %v89_v14 = vadd.f32 %v371_v12, %v88_v13 }
  0xc7   :  { %v407_v15 = vpop.f32.mrf.mxu0 }
  0xc8   :  { %v94_v16 = vmax.f32 %v89_v14, 0.0 }
  0xc9   :  { %v91_v17 = vpop.f32.mrf.mxu0 }
  0xca   :  { %v95_v18 = vpack.c.bf16 %v94_v16, %v94_v16 }
  0xcb   :  { %v408_v19 = vpop.f32.mrf.mxu0 }
  0xcc   :  { %418 = vmatmul.mubr.msk.bf16.vlgmr.msra.gmra.mxu1 %vm135_vm2, %v95_v18  ;;  %430 = vmatmul.mubr.msk.bf16.vlgmr.msra.gmra.mxu0 %vm135_vm2, %v95_v18 }
  0xcd   :  { %437 = vmatprep.mubr.msk.f32.mxu1 %vm477_vm1, %v476_v1  ;;  %434 = vmatpush3.msra.mxu1 %v263_v20 }
  0xce   :  { %435 = vmatprep.subr.mxu1 %v476_v1 }
  0xcf   :  { %436 = vmatpush3.msra.mxu1 %v262_v21 }
 0x18c   :  { %v173_v23 = vpop.f32.mrf.mxu1  ;;  %v252_v24 = vpop.f32.mrf.mxu0 }
 0x18d   :  { %v174_v25 = vadd.f32 %v374_v22, %v173_v23  ;;  %v253_v35 = vadd.f32 %v380_v33, %v252_v24 }
 0x18e   :  { %v419_v26 = vpop.f32.mrf.mxu1  ;;  %v431_v27 = vpop.f32.mrf.mxu0 }
 0x18f   :  { %v258_v28 = vmul.f32 1.442695, %v174_v25  ;;  %v344_v41 = vsel %vm50_vm0, %v174_v25, 0.0 }
 0x190   :  { %v176_v29 = vpop.f32.mrf.mxu1  ;;  %v255_v30 = vpop.f32.mrf.mxu0 }
 0x191   :  { %452 = vpow2.f32 %v258_v28 }
 0x192   :  { %v420_v31 = vpop.f32.mrf.mxu1  ;;  %v432_v32 = vpop.f32.mrf.mxu0 }
 0x19e   :  { %v453_v34 = vpop.eup %452 }
 0x19f   :  { %v260_v36 = vmul.f32 %v453_v34, %v535_v2 }
 0x1a1   :  { %v261_v37 = vadd.f32 %v260_v36, %v253_v35 }
 0x1a3   :  { %438 = vmatmul.mubr.msk.f32.vlgmr.msra.gmra.mxu1 %vm50_vm0, %v261_v37  ;;  %v338_v38 = vmul.f32 -0.5, %v261_v37 }
 0x1a5   :  { %v339_v39 = vmul.f32 %v338_v38, %v261_v37 }
 0x1a7   :  { %v340_v40 = vsel %vm50_vm0, %v339_v39, 0.0 }
 0x1a8   :  { %341 = vadd.xlane.f32.xlu0 %v340_v40 }
 0x1ac   :  { %345 = vadd.xlane.f32.xlu0 %v344_v41 }
 0x231   :  { %v342_v44 = vpop.xlane.xlu0 %341 }
 0x232   :  { %v387_v45 = vadd.f32 -14.703016, %v342_v44 }
 0x235   :  { %v346_v46 = vpop.xlane.xlu0 %345 }
 0x236   :  { %v350_v47 = vsel %vm349_vm3, %v387_v45, %v346_v46 }
 0x237   :  { %352 = vst.msk [vmem:[%s603_s9] sm:$0xff] %vm351_vm4, %v350_v47 }
 0x263   :  { %v333_v48 = vpop.f32.mrf.mxu1 }
 0x264   :  { %337 = vst.msk [vmem:[#allocation2] sm:$0xff] %vm50_vm0, %v333_v48 }
 0x265   :  { %v439_v49 = vpop.f32.mrf.mxu1 }
 0x266   :  { %465 = shalt.err (!%p462_p4)
}
 0x267   :  { %362 = dma.vmem_to_hbm [thread:$0]  %s360_s13, 128, %s602_s8, [#allocation3]  }
 0x268   :  { %474 = dma.done.wait [#allocation3], 128  }
 0x269   :  { %475 = vsyncadd [#allocation3], 4294967168 }
 0x26a   :  { %370 = vsyncpa [#allocation3], 1 }

// kernel: tpu_custom_call.1
= control target key start
LH: loop header
LB: loop body
LE: loop exit
PB: predicated region body
PF: predicated region fallthrough
CT: control target
= control target key end

     0   :  { %v476_v1 = vmov 0.0   ;;  %vm50_vm0 = vcmask 130048   ;;  %vm477_vm1 = vmmov 0   ;;  %s594_s0 = inlined_call_operand.vmem [shape: f32[8,16], index: 0, kind: input, shape index: {}]   ;;  %s595_s1 = inlined_call_operand.vmem [shape: bf16[16,64], index: 1, kind: input, shape index: {}]   ;;  %s596_s2 = inlined_call_operand.vmem [shape: f32[1,64], index: 2, kind: input, shape index: {}]   ;;  %s597_s3 = inlined_call_operand.vmem [shape: bf16[64,16], index: 3, kind: input, shape index: {}]   ;;  %s598_s4 = inlined_call_operand.vmem [shape: f32[1,16], index: 4, kind: input, shape index: {}]   ;;  %s599_s5 = inlined_call_operand.vmem [shape: bf16[64,16], index: 5, kind: input, shape index: {}]   ;;  %s600_s6 = inlined_call_operand.vmem [shape: f32[1,16], index: 6, kind: input, shape index: {}]   ;;  %s601_s7 = inlined_call_operand.vmem [shape: f32[16,16], index: 7, kind: input, shape index: {}]   ;;  %s602_s8 = inlined_call_operand.hbm [shape: f32[8,16], index: 8, kind: output, shape index: {0}]   ;;  %s603_s9 = inlined_call_operand.vmem [shape: f32[8,2], index: 9, kind: output, shape index: {1}]  }
   0x1   :  { %v443_v0 = vld [vmem:[%s595_s1] sm:$0xff]   ;;  %403 = vmatprep.subr.bf16.mxu0 %v476_v1  ;;  %409 = vmatprep.subr.bf16.mxu1 %v476_v1  ;;  %v444_v3 = vld [vmem:[%s597_s3 + $0x18] sm:$0xff]   ;;  %v446_v6 = vld [vmem:[%s597_s3 + $0x10] sm:$0xff]  }
   0x2   :  { %v535_v2 = vld [vmem:[%s594_s0] sm:$0xff]  ;;  %404 = vmatpush3.bf16.msra.mxu0 %v443_v0  ;;  %405 = vmatprep.mubr.msk.bf16.mxu0 %vm477_vm1, %v476_v1  ;;  %v445_v5 = vld [vmem:[%s599_s5 + $0x18] sm:$0xff]   ;;  %v447_v7 = vld [vmem:[%s599_s5 + $0x10] sm:$0xff]  }
   0x3   :  { %v34_v4 = vpack.c.bf16 %v535_v2, %v535_v2  ;;  %421 = vmatprep.subr.bf16.mxu0 %v476_v1  ;;  %410 = vmatpush3.bf16.msra.mxu1 %v444_v3 }
   0x4   :  { %411 = vmatprep.subr.bf16.mxu1 %v476_v1  ;;  %417 = vmatprep.mubr.msk.bf16.mxu1 %vm477_vm1, %v476_v1 }
   0x5   :  { %406 = vmatmul.mubr.msk.bf16.vlgmr.msra.gmra.mxu0 %vm50_vm0, %v34_v4 }
   0x6   :  { %422 = vmatpush3.bf16.msra.mxu0 %v445_v5  ;;  %429 = vmatprep.mubr.msk.bf16.mxu0 %vm477_vm1, %v476_v1 }
   0x7   :  { %423 = vmatprep.subr.bf16.mxu0 %v476_v1  ;;  %412 = vmatpush3.bf16.msra.mxu1 %v446_v6 }
   0x8   :  { %413 = vmatprep.subr.bf16.mxu1 %v476_v1 }
   0x9   :  { %15 = vsyncpa [#allocation3], 0  ;;  %v448_v8 = vld [vmem:[%s597_s3 + $0x8] sm:$0xff]   ;;  %v450_v10 = vld [vmem:[%s597_s3] sm:$0xff]   ;;  %vm135_vm2 = vcmask 523264   ;;  %v347_v42 = vlaneseq  ;;  %vm351_vm4 = vcmask 15360  }
   0xa   :  { %424 = vmatpush3.bf16.msra.mxu0 %v447_v7  ;;  %v449_v9 = vld [vmem:[%s599_s5 + $0x8] sm:$0xff]   ;;  %v451_v11 = vld [vmem:[%s599_s5] sm:$0xff]  }
   0xb   :  { %425 = vmatprep.subr.bf16.mxu0 %v476_v1  ;;  %414 = vmatpush3.bf16.msra.mxu1 %v448_v8  ;;  %v371_v12 = vld [vmem:[%s596_s2] ss:$0 sm:$0xff]  ;;  %v263_v20 = vld [vmem:[%s601_s7 + $0x8] sm:$0xff]  ;;  %v348_v43 = vand.u32 127, %v347_v42 }
   0xc   :  { %415 = vmatprep.subr.bf16.mxu1 %v476_v1  ;;  %v262_v21 = vld [vmem:[%s601_s7] sm:$0xff]  ;;  %s478_s7 = smov [#allocation2]  }
   0xd   :  { %v374_v22 = vld [vmem:[%s598_s4] ss:$0 sm:$0xff]  ;;  %vm349_vm3 = vcmp.eq.s32.totalorder %v348_v43, 0  ;;  %s359_s13 = sshll.u32 %s478_s7, 4  ;;  %s360_s13 = int_to_ptr.vmem [resolvable:$true] %s359_s13 }
   0xe   :  { %426 = vmatpush3.bf16.msra.mxu0 %v449_v9  ;;  %v380_v33 = vld [vmem:[%s600_s6] ss:$0 sm:$0xff]  ;;  %s454_s14 = scalar_lea.vmem %s360_s13, 128  ;;  %p459_p1 = scmp.lt.s32.totalorder %s360_s13, %s360_s13 }
   0xf   :  { %427 = vmatprep.subr.bf16.mxu0 %v476_v1  ;;  %416 = vmatpush3.bf16.msra.mxu1 %v450_v10  ;;  %p455_p0 = scmp.ne.s32.totalorder %s360_s13, %s454_s14  ;;  %p460_p2 = scmp.lt.s32.totalorder %s454_s14, %s454_s14 }
  0x10   :  { %433 = vmatprep.subr.mxu1 %v476_v1 }
  0x11   :  { %p461_p3 = por %p460_p2, %p459_p1 }
  0x12   :  { %428 = vmatpush3.bf16.msra.mxu0 %v451_v11 }
  0x13   :  { %p462_p4 = pnand %p461_p3, %p455_p0 }
  0xc5   :  { %v88_v13 = vpop.f32.mrf.mxu0 }
  0xc6   :  { %v89_v14 = vadd.f32 %v371_v12, %v88_v13 }
  0xc7   :  { %v407_v15 = vpop.f32.mrf.mxu0 }
  0xc8   :  { %v94_v16 = vmax.f32 %v89_v14, 0.0 }
  0xc9   :  { %v91_v17 = vpop.f32.mrf.mxu0 }
  0xca   :  { %v95_v18 = vpack.c.bf16 %v94_v16, %v94_v16 }
  0xcb   :  { %v408_v19 = vpop.f32.mrf.mxu0 }
  0xcc   :  { %418 = vmatmul.mubr.msk.bf16.vlgmr.msra.gmra.mxu1 %vm135_vm2, %v95_v18  ;;  %430 = vmatmul.mubr.msk.bf16.vlgmr.msra.gmra.mxu0 %vm135_vm2, %v95_v18 }
  0xcd   :  { %437 = vmatprep.mubr.msk.f32.mxu1 %vm477_vm1, %v476_v1  ;;  %434 = vmatpush3.msra.mxu1 %v263_v20 }
  0xce   :  { %435 = vmatprep.subr.mxu1 %v476_v1 }
  0xcf   :  { %436 = vmatpush3.msra.mxu1 %v262_v21 }
 0x18c   :  { %v173_v23 = vpop.f32.mrf.mxu1  ;;  %v252_v24 = vpop.f32.mrf.mxu0 }
 0x18d   :  { %v174_v25 = vadd.f32 %v374_v22, %v173_v23  ;;  %v253_v35 = vadd.f32 %v380_v33, %v252_v24 }
 0x18e   :  { %v419_v26 = vpop.f32.mrf.mxu1  ;;  %v431_v27 = vpop.f32.mrf.mxu0 }
 0x18f   :  { %v258_v28 = vmul.f32 1.442695, %v174_v25  ;;  %v344_v41 = vsel %vm50_vm0, %v174_v25, 0.0 }
 0x190   :  { %v176_v29 = vpop.f32.mrf.mxu1  ;;  %v255_v30 = vpop.f32.mrf.mxu0 }
 0x191   :  { %452 = vpow2.f32 %v258_v28 }
 0x192   :  { %v420_v31 = vpop.f32.mrf.mxu1  ;;  %v432_v32 = vpop.f32.mrf.mxu0 }
 0x19e   :  { %v453_v34 = vpop.eup %452 }
 0x19f   :  { %v260_v36 = vmul.f32 %v453_v34, %v535_v2 }
 0x1a1   :  { %v261_v37 = vadd.f32 %v260_v36, %v253_v35 }
 0x1a3   :  { %438 = vmatmul.mubr.msk.f32.vlgmr.msra.gmra.mxu1 %vm50_vm0, %v261_v37  ;;  %v338_v38 = vmul.f32 -0.5, %v261_v37 }
 0x1a5   :  { %v339_v39 = vmul.f32 %v338_v38, %v261_v37 }
 0x1a7   :  { %v340_v40 = vsel %vm50_vm0, %v339_v39, 0.0 }
 0x1a8   :  { %341 = vadd.xlane.f32.xlu0 %v340_v40 }
 0x1ac   :  { %345 = vadd.xlane.f32.xlu0 %v344_v41 }
 0x231   :  { %v342_v44 = vpop.xlane.xlu0 %341 }
 0x232   :  { %v387_v45 = vadd.f32 -14.703016, %v342_v44 }
 0x235   :  { %v346_v46 = vpop.xlane.xlu0 %345 }
 0x236   :  { %v350_v47 = vsel %vm349_vm3, %v387_v45, %v346_v46 }
 0x237   :  { %352 = vst.msk [vmem:[%s603_s9] sm:$0xff] %vm351_vm4, %v350_v47 }
 0x263   :  { %v333_v48 = vpop.f32.mrf.mxu1 }
 0x264   :  { %337 = vst.msk [vmem:[#allocation2] sm:$0xff] %vm50_vm0, %v333_v48 }
 0x265   :  { %v439_v49 = vpop.f32.mrf.mxu1 }
 0x266   :  { %465 = shalt.err (!%p462_p4)
}
 0x267   :  { %362 = dma.vmem_to_hbm [thread:$0]  %s360_s13, 128, %s602_s8, [#allocation3]  }
 0x268   :  { %474 = dma.done.wait [#allocation3], 128  }
 0x269   :  { %475 = vsyncadd [#allocation3], 4294967168 }
 0x26a   :  { %370 = vsyncpa [#allocation3], 1 }

</bundles_post_ra>
